<compile_context>
chip_gen: v5e
topology: v5e:2x2
jax: 0.10.0
libtpu: 0.0.40
codegen_flags: <defaults>
</compile_context>

<pallas_src>
import functools

import jax
import jax.numpy as jnp
from jax.experimental import pallas as pl
from jax.experimental.pallas import tpu as pltpu


LATENT_SIZE = 20
LAYER_SIZES = [32, 64, 784]   # hidden1, hidden2, output (28*28 MNIST pixels)


def _round_up(x, m):
    return ((x + m - 1) // m) * m


def _bf16_eup_ok():
    """bf16 transcendental path only on v6e / v7x (older chips: f32 EUP)."""
    try:
        kind = jax.devices()[0].device_kind.lower()
    except Exception:
        return False
    for tag in ("v2", "v3", "v4", "v5"):
        if tag in kind:
            return False
    return True


def decoder_kernel(z_ref, w0_ref, b0_ref, w1_ref, b1_ref, w2_ref, b2_ref, o_ref,
                   *, use_bf16_tanh):
    # Layer 0: Linear + ReLU  (bf16 operands on the MXU, f32 accumulate)
    h = jnp.dot(z_ref[...], w0_ref[...], preferred_element_type=jnp.float32)
    h = jnp.maximum(h + b0_ref[...], 0.0)

    # Layer 1: Linear + ReLU
    h = jnp.dot(h.astype(jnp.bfloat16), w1_ref[...],
                preferred_element_type=jnp.float32)
    h = jnp.maximum(h + b1_ref[...], 0.0)

    # Layer 2: Linear + Sigmoid  (sigmoid(x) = 0.5*(tanh(0.5*x)+1) -> one EUP op)
    h = jnp.dot(h.astype(jnp.bfloat16), w2_ref[...],
                preferred_element_type=jnp.float32)
    h = h + b2_ref[...]
    if use_bf16_tanh:
        # v6e / v7x: bf16 EUP is ~2x faster; keeps the kernel store-bound.
        t = jnp.tanh((0.5 * h).astype(jnp.bfloat16))
        y = 0.5 * (t + 1.0)
    else:
        y = 0.5 * (jnp.tanh(0.5 * h) + 1.0)
    o_ref[...] = y.astype(o_ref.dtype)


def prepare_params(params):
    """One-time (per model, not per call) conversion of weights to bf16."""
    return [(w.astype(jnp.bfloat16), b.astype(jnp.float32)) for (w, b) in params]


def decoder_forward(z, prepared_params, *, batch_tile=1024, out_dtype=jnp.bfloat16):
    """prepared_params = prepare_params([(w0,b0),(w1,b1),(w2,b2)]), w_i:(in,out), b_i:(1,out).

    Computes sigmoid(relu(relu(z@w0+b0)@w1+b1)@w2+b2) with a batch-tiled Pallas
    kernel; weights stay resident in VMEM across batch tiles, output is written
    once, lane-width 784, in bf16 (f32 accumulation inside the kernel).
    """
    (w0, b0), (w1, b1), (w2, b2) = prepared_params
    B, latent = z.shape
    h0 = w0.shape[1]
    h1 = w1.shape[1]
    out_dim = w2.shape[1]

    # Batch tile: multiple of 8 sublanes; capped so there are >= 2 grid steps
    # when possible (keeps both v7x TensorCores busy for moderate B).
    tb = min(batch_tile, max(8, _round_up(-(-B // 2), 8)))
    pB = _round_up(B, tb)

    zp = z.astype(jnp.bfloat16)                 # halve z-tile DMA
    if pB != B:
        zp = jnp.pad(zp, ((0, pB - B), (0, 0)))

    const = lambda i: (0, 0)   # weights / biases: same block for every grid step

    kernel = functools.partial(decoder_kernel, use_bf16_tanh=_bf16_eup_ok())

    out = pl.pallas_call(
        kernel,
        out_shape=jax.ShapeDtypeStruct((pB, out_dim), out_dtype),
        grid=(pB // tb,),
        in_specs=[
            pl.BlockSpec((tb, latent), lambda i: (i, 0)),   # z tile (pipelined)
            pl.BlockSpec((latent, h0), const),              # w0 (resident)
            pl.BlockSpec((1, h0), const),                   # b0
            pl.BlockSpec((h0, h1), const),                  # w1
            pl.BlockSpec((1, h1), const),                   # b1
            pl.BlockSpec((h1, out_dim), const),             # w2 (no padding)
            pl.BlockSpec((1, out_dim), const),              # b2
        ],
        out_specs=pl.BlockSpec((tb, out_dim), lambda i: (i, 0)),
        compiler_params=pltpu.CompilerParams(
            dimension_semantics=("parallel",),      # shard batch tiles across TCs
            vmem_limit_bytes=32 * 1024 * 1024,      # safe on v5e/v6e/v7x
        ),
    )(zp, w0, b0, w1, b1, w2, b2)

    # Only strip batch padding rows (no column slice -> no extra output pass).
    if pB != B:
        out = out[:B]
    return out


def init_params(key, latent_size, layer_sizes):
    """Deterministic synthetic init (uniform, fan-in scaled, like PyTorch default)."""
    params = []
    in_sizes = [latent_size] + layer_sizes[:-1]
    for fan_in, fan_out in zip(in_sizes, layer_sizes):
        kw, kb, key = jax.random.split(key, 3)
        bound = 1.0 / jnp.sqrt(fan_in)
        w = jax.random.uniform(kw, (fan_in, fan_out), jnp.float32, -bound, bound)
        b = jax.random.uniform(kb, (1, fan_out), jnp.float32, -bound, bound)
        params.append((w, b))
    return params


def decoder_reference(z, params):
    (w0, b0), (w1, b1), (w2, b2) = params
    h = jnp.maximum(z @ w0 + b0, 0.0)
    h = jnp.maximum(h @ w1 + b1, 0.0)
    return jax.nn.sigmoid(h @ w2 + b2)


if __name__ == "__main__":
    key = jax.random.PRNGKey(0)
    kz1, kz2, kp = jax.random.split(key, 3)

    params = init_params(kp, LATENT_SIZE, LAYER_SIZES)
    prepared = prepare_params(params)

    # Case 1: small batch, single grid step.
    B = 8
    z = jax.random.normal(kz1, (B, LATENT_SIZE), dtype=jnp.float32)
    out = jax.block_until_ready(decoder_forward(z, prepared))
    ref = decoder_reference(z, params)
    assert out.shape == (B, LAYER_SIZES[-1])
    err = float(jnp.max(jnp.abs(out.astype(jnp.float32) - ref)))
    # bf16 weights + bf16 tanh (v6e/v7x) + bf16 output => ~1e-2-level deviation.
    assert err < 3e-2, f"single-tile mismatch vs reference (max err {err})"

    # Case 2: B not a multiple of the batch tile -> exercises batch padding,
    # the multi-step grid, and the megacore tile split.
    B2 = 250
    z2 = jax.random.normal(kz2, (B2, LATENT_SIZE), dtype=jnp.float32)
    out2 = jax.block_until_ready(decoder_forward(z2, prepared, batch_tile=64))
    ref2 = decoder_reference(z2, params)
    assert out2.shape == (B2, LAYER_SIZES[-1])
    err2 = float(jnp.max(jnp.abs(out2.astype(jnp.float32) - ref2)))
    assert err2 < 3e-2, f"multi-tile mismatch vs reference (max err {err2})"

    print("KERNEL_OK")
</pallas_src>

<mosaic_0001>
module attributes {stable_mosaic.version = 11 : i64} {
  func.func @decoder_kernel(%arg0: i32, %arg1: memref<8x20xbf16, #tpu.memory_space<vmem>>, %arg2: memref<20x32xbf16, #tpu.memory_space<vmem>>, %arg3: memref<1x32xf32, #tpu.memory_space<vmem>>, %arg4: memref<32x64xbf16, #tpu.memory_space<vmem>>, %arg5: memref<1x64xf32, #tpu.memory_space<vmem>>, %arg6: memref<64x784xbf16, #tpu.memory_space<vmem>>, %arg7: memref<1x784xf32, #tpu.memory_space<vmem>>, %arg8: memref<8x784xbf16, #tpu.memory_space<vmem>>) attributes {dimension_semantics = [#tpu.dimension_semantics<parallel>], iteration_bounds = array<i64: 1>, scalar_prefetch = 0 : i64, scratch_operands = 0 : i64, tpu.core_type = #tpu.core_type<tc>, window_params = [{transform_indices = @transform_0, window_bounds = array<i64: 8, 20>}, {pipeline_mode = #tpu.pipeline_mode<synchronous>, transform_indices = @transform_1, window_bounds = array<i64: 20, 32>}, {pipeline_mode = #tpu.pipeline_mode<synchronous>, transform_indices = @transform_2, window_bounds = array<i64: 1, 32>}, {pipeline_mode = #tpu.pipeline_mode<synchronous>, transform_indices = @transform_3, window_bounds = array<i64: 32, 64>}, {pipeline_mode = #tpu.pipeline_mode<synchronous>, transform_indices = @transform_4, window_bounds = array<i64: 1, 64>}, {pipeline_mode = #tpu.pipeline_mode<synchronous>, transform_indices = @transform_5, window_bounds = array<i64: 64, 784>}, {pipeline_mode = #tpu.pipeline_mode<synchronous>, transform_indices = @transform_6, window_bounds = array<i64: 1, 784>}, {transform_indices = @transform_7, window_bounds = array<i64: 8, 784>}]} {
    %c0 = arith.constant 0 : index
    %c0_0 = arith.constant 0 : index
    %0 = vector.load %arg1[%c0, %c0_0] : memref<8x20xbf16, #tpu.memory_space<vmem>>, vector<8x20xbf16>
    %c0_1 = arith.constant 0 : index
    %c0_2 = arith.constant 0 : index
    %1 = vector.load %arg2[%c0_1, %c0_2] : memref<20x32xbf16, #tpu.memory_space<vmem>>, vector<20x32xbf16>
    %cst = arith.constant dense<0.000000e+00> : vector<8x32xf32>
    %2 = tpu.matmul %0, %1, %cst {dimension_numbers = #tpu.dot_dimension_numbers<[1], [0], [0], [1], [0, 0, 1, 1], [], []>} : vector<8x20xbf16>, vector<20x32xbf16>, vector<8x32xf32> -> vector<8x32xf32>
    %c0_3 = arith.constant 0 : index
    %c0_4 = arith.constant 0 : index
    %3 = vector.load %arg3[%c0_3, %c0_4] : memref<1x32xf32, #tpu.memory_space<vmem>>, vector<1x32xf32>
    %4 = vector.broadcast %3 : vector<1x32xf32> to vector<8x32xf32>
    %5 = arith.addf %2, %4 : vector<8x32xf32>
    %cst_5 = arith.constant 0.000000e+00 : f32
    %6 = vector.broadcast %cst_5 : f32 to vector<8x32xf32>
    %7 = arith.maximumf %5, %6 : vector<8x32xf32>
    %8 = arith.truncf %7 : vector<8x32xf32> to vector<8x32xbf16>
    %c0_6 = arith.constant 0 : index
    %c0_7 = arith.constant 0 : index
    %9 = vector.load %arg4[%c0_6, %c0_7] : memref<32x64xbf16, #tpu.memory_space<vmem>>, vector<32x64xbf16>
    %cst_8 = arith.constant dense<0.000000e+00> : vector<8x64xf32>
    %10 = tpu.matmul %8, %9, %cst_8 {dimension_numbers = #tpu.dot_dimension_numbers<[1], [0], [0], [1], [0, 0, 1, 1], [], []>} : vector<8x32xbf16>, vector<32x64xbf16>, vector<8x64xf32> -> vector<8x64xf32>
    %c0_9 = arith.constant 0 : index
    %c0_10 = arith.constant 0 : index
    %11 = vector.load %arg5[%c0_9, %c0_10] : memref<1x64xf32, #tpu.memory_space<vmem>>, vector<1x64xf32>
    %12 = vector.broadcast %11 : vector<1x64xf32> to vector<8x64xf32>
    %13 = arith.addf %10, %12 : vector<8x64xf32>
    %cst_11 = arith.constant 0.000000e+00 : f32
    %14 = vector.broadcast %cst_11 : f32 to vector<8x64xf32>
    %15 = arith.maximumf %13, %14 : vector<8x64xf32>
    %16 = arith.truncf %15 : vector<8x64xf32> to vector<8x64xbf16>
    %c0_12 = arith.constant 0 : index
    %c0_13 = arith.constant 0 : index
    %17 = vector.load %arg6[%c0_12, %c0_13] : memref<64x784xbf16, #tpu.memory_space<vmem>>, vector<64x784xbf16>
    %cst_14 = arith.constant dense<0.000000e+00> : vector<8x784xf32>
    %18 = tpu.matmul %16, %17, %cst_14 {dimension_numbers = #tpu.dot_dimension_numbers<[1], [0], [0], [1], [0, 0, 1, 1], [], []>} : vector<8x64xbf16>, vector<64x784xbf16>, vector<8x784xf32> -> vector<8x784xf32>
    %c0_15 = arith.constant 0 : index
    %c0_16 = arith.constant 0 : index
    %19 = vector.load %arg7[%c0_15, %c0_16] : memref<1x784xf32, #tpu.memory_space<vmem>>, vector<1x784xf32>
    %20 = vector.broadcast %19 : vector<1x784xf32> to vector<8x784xf32>
    %21 = arith.addf %18, %20 : vector<8x784xf32>
    %cst_17 = arith.constant 5.000000e-01 : f32
    %22 = vector.broadcast %cst_17 : f32 to vector<8x784xf32>
    %23 = arith.mulf %22, %21 : vector<8x784xf32>
    %24 = arith.truncf %23 : vector<8x784xf32> to vector<8x784xbf16>
    %25 = math.tanh %24 : vector<8x784xbf16>
    %cst_18 = arith.constant 1.000000e+00 : bf16
    %26 = vector.broadcast %cst_18 : bf16 to vector<8x784xbf16>
    %27 = arith.addf %25, %26 : vector<8x784xbf16>
    %cst_19 = arith.constant 5.000000e-01 : bf16
    %28 = vector.broadcast %cst_19 : bf16 to vector<8x784xbf16>
    %29 = arith.mulf %28, %27 : vector<8x784xbf16>
    %c0_20 = arith.constant 0 : index
    %c0_21 = arith.constant 0 : index
    %30 = vector.load %arg8[%c0_20, %c0_21] : memref<8x784xbf16, #tpu.memory_space<vmem>>, vector<8x784xbf16>
    tpu.vector_store %arg8[%c0_20, %c0_21], %29 {strides = array<i32>} : memref<8x784xbf16, #tpu.memory_space<vmem>>, vector<8x784xbf16>,
    return
  }
  func.func @transform_0(%arg0: i32) -> (i32, i32) {
    %c0_i32 = arith.constant 0 : i32
    %c0_i32_0 = arith.constant 0 : i32
    return %arg0, %c0_i32 : i32, i32
  }
  func.func @transform_1(%arg0: i32) -> (i32, i32) {
    %c0_i32 = arith.constant 0 : i32
    %c0_i32_0 = arith.constant 0 : i32
    %c0_i32_1 = arith.constant 0 : i32
    return %c0_i32, %c0_i32_0 : i32, i32
  }
  func.func @transform_2(%arg0: i32) -> (i32, i32) {
    %c0_i32 = arith.constant 0 : i32
    %c0_i32_0 = arith.constant 0 : i32
    %c0_i32_1 = arith.constant 0 : i32
    return %c0_i32, %c0_i32_0 : i32, i32
  }
  func.func @transform_3(%arg0: i32) -> (i32, i32) {
    %c0_i32 = arith.constant 0 : i32
    %c0_i32_0 = arith.constant 0 : i32
    %c0_i32_1 = arith.constant 0 : i32
    return %c0_i32, %c0_i32_0 : i32, i32
  }
  func.func @transform_4(%arg0: i32) -> (i32, i32) {
    %c0_i32 = arith.constant 0 : i32
    %c0_i32_0 = arith.constant 0 : i32
    %c0_i32_1 = arith.constant 0 : i32
    return %c0_i32, %c0_i32_0 : i32, i32
  }
  func.func @transform_5(%arg0: i32) -> (i32, i32) {
    %c0_i32 = arith.constant 0 : i32
    %c0_i32_0 = arith.constant 0 : i32
    %c0_i32_1 = arith.constant 0 : i32
    return %c0_i32, %c0_i32_0 : i32, i32
  }
  func.func @transform_6(%arg0: i32) -> (i32, i32) {
    %c0_i32 = arith.constant 0 : i32
    %c0_i32_0 = arith.constant 0 : i32
    %c0_i32_1 = arith.constant 0 : i32
    return %c0_i32, %c0_i32_0 : i32, i32
  }
  func.func @transform_7(%arg0: i32) -> (i32, i32) {
    %c0_i32 = arith.constant 0 : i32
    %c0_i32_0 = arith.constant 0 : i32
    return %arg0, %c0_i32 : i32, i32
  }
}

</mosaic_0001>

<bundles_post_ra>
// kernel: tpu_custom_call.1
= control target key start
LH: loop header
LB: loop body
LE: loop exit
PB: predicated region body
PF: predicated region fallthrough
CT: control target
= control target key end

     0   :  { %12 = vsyncpa [#allocation3], 0  ;;  %s973_s0 = inlined_call_operand.hbm [shape: bf16[8,20], index: 0, kind: input, shape index: {}]   ;;  %s974_s1 = inlined_call_operand.hbm [shape: bf16[20,32], index: 1, kind: input, shape index: {}]   ;;  %s975_s2 = inlined_call_operand.vmem [shape: f32[1,32], index: 2, kind: input, shape index: {}]   ;;  %s976_s3 = inlined_call_operand.hbm [shape: bf16[32,64], index: 3, kind: input, shape index: {}]   ;;  %s977_s4 = inlined_call_operand.vmem [shape: f32[1,64], index: 4, kind: input, shape index: {}]   ;;  %s978_s5 = inlined_call_operand.hbm [shape: bf16[64,784], index: 5, kind: input, shape index: {}]   ;;  %s979_s6 = inlined_call_operand.hbm [shape: f32[1,784], index: 6, kind: input, shape index: {}]   ;;  %s980_s7 = inlined_call_operand.hbm [shape: bf16[8,784], index: 7, kind: output, shape index: {}]  }
   0x1   :  { %13 = vsyncpa [#allocation6], 0 }
   0x2   :  { %14 = vsyncpa [#allocation9], 0  ;;  %s31_s26 = sshll.u32 %s974_s1, 4  ;;  %s32_s26 = int_to_ptr.hbm [resolvable:$true] %s31_s26 }
   0x3   :  { %15 = vsyncpa [#allocation4], 0  ;;  %s899_s27 = smov [#allocation5]   ;;  %s61_s8 = sshll.u32 %s978_s5, 4  ;;  %s62_s8 = int_to_ptr.hbm [resolvable:$true] %s61_s8 }
   0x4   :  { %s33_s28 = sshll.u32 %s899_s27, 4  ;;  %s900_s9 = smov 64   ;;  %s34_s28 = int_to_ptr.vmem [resolvable:$true] %s33_s28 }
   0x5   :  { %s901_s10 = smov 4   ;;  %s902_s11 = smov [#allocation8]  }
   0x6   :  { %39 = dma.hbm_to_vmem [thread:$0]  %s32_s26, 192, %s34_s28, [#allocation6], %s900_s9, %s900_s9, %s901_s10  }
   0x7   :  { %s63_s12 = sshll.u32 %s902_s11, 4  ;;  %s903_s13 = smov 448   ;;  %s64_s12 = int_to_ptr.vmem [resolvable:$true] %s63_s12 }
   0x8   :  { %s904_s14 = smov 28   ;;  %s21_s16 = sshll.u32 %s973_s0, 4  ;;  %s22_s16 = int_to_ptr.hbm [resolvable:$true] %s21_s16 }
   0x9   :  { %69 = dma.hbm_to_vmem [thread:$0]  %s62_s8, 3584, %s64_s12, [#allocation9], %s903_s13, %s903_s13, %s904_s14  }
   0xa   :  { %s905_s17 = smov [#allocation2]   ;;  %s46_s20 = sshll.u32 %s976_s3, 4  ;;  %s47_s20 = int_to_ptr.hbm [resolvable:$true] %s46_s20 }
   0xb   :  { %s23_s18 = sshll.u32 %s905_s17, 4  ;;  %s906_s21 = smov [#allocation7]   ;;  %s24_s18 = int_to_ptr.vmem [resolvable:$true] %s23_s18 }
   0xc   :  { %26 = dma.hbm_to_vmem [thread:$0]  %s22_s16, 64, %s24_s18, [#allocation3]  }
   0xd   :  { %s48_s22 = sshll.u32 %s906_s21, 4  ;;  %s75_s25 = sshll.u32 %s979_s6, 4  ;;  %s49_s22 = int_to_ptr.vmem [resolvable:$true] %s48_s22  ;;  %s76_s25 = int_to_ptr.hbm [resolvable:$true] %s75_s25 }
   0xe   :  { %54 = dma.hbm_to_vmem [thread:$0]  %s47_s20, 256, %s49_s22, [#allocation6], %s900_s9, %s900_s9, %s901_s10  }
   0xf   :  { %s907_s0 = smov [#allocation10]  }
  0x10   :  { %s77_s26 = sshll.u32 %s907_s0, 4  ;;  %s78_s26 = int_to_ptr.vmem [resolvable:$true] %s77_s26 }
  0x11   :  { %80 = dma.hbm_to_vmem [thread:$0]  %s76_s25, 112, %s78_s26, [#allocation9]  }
  0x12   :  { %891 = dma.done.wait [#allocation3], 64  }
  0x13   :  { %892 = vsyncadd [#allocation3], 4294967232 }
  0x14   :  { %893 = dma.done.wait [#allocation6], 448  }
  0x15   :  { %894 = vsyncadd [#allocation6], 4294966848 }
  0x16   :  { %895 = dma.done.wait [#allocation9], 3696  }
  0x17   :  { %896 = vsyncadd [#allocation9], 4294963600  ;;  %v105_v0 = vld [vmem:[#allocation5 + $0x8] sm:$0x3]  ;;  %vm123_vm0 = vcmask 1041408   ;;  %v690_v4 = vld [vmem:[#allocation5] sm:$0xff] }
  0x18   :  { %v115_v1 = vunpack.c.l.b16 %v105_v0  ;;  %v102_v5 = vld [vmem:[#allocation2] sm:$0xf]  ;;  %vm119_vm1 = vcmask 162816   ;;  %v692_v6 = vld [vmem:[#allocation7 + $0x8] sm:$0xff]  ;;  %v691_v7 = vld [vmem:[#allocation7] sm:$0xff]  ;;  %vm162_vm2 = vcmask 261120  }
  0x19   :  { %172 = vmatpush.bf16.msra.mxu1 %v692_v6  ;;  %v657_v8 = vld [vmem:[#allocation8 + $0xa8] sm:$0xf]  ;;  %v717_v9 = vld [vmem:[#allocation8 + $0xc0] sm:$0xf0]  ;;  %v714_v10 = vld [vmem:[#allocation8 + $0xac] sm:$0xf] }
  0x1a   :  { %v117_v2 = vpack.c.b16 %v115_v1, %v115_v1  ;;  %v658_v11 = vor.u32 %v717_v9, %v657_v8  ;;  %v659_v12 = vld [vmem:[#allocation8 + $0xc4] sm:$0xf0]  ;;  %v665_v13 = vld [vmem:[#allocation8 + $0xb0] sm:$0xf]  ;;  %v718_v14 = vld [vmem:[#allocation8 + $0xc8] sm:$0xf0] }
  0x1b   :  { %v662_v15 = vor.u32 %v714_v10, %v659_v12  ;;  %v666_v16 = vor.u32 %v718_v14, %v665_v13  ;;  %v715_v17 = vld [vmem:[#allocation8 + $0xb4] sm:$0xf]  ;;  %v667_v18 = vld [vmem:[#allocation8 + $0xcc] sm:$0xf0]  ;;  %v710_v21 = vld [vmem:[#allocation8 + $0x88] sm:$0xf0] }
  0x1c   :  { %v125_v3 = vsel %vm123_vm0, %v117_v2, 0  ;;  %v629_v19 = vld [vmem:[#allocation8 + $0x70] sm:$0xf]  ;;  %381 = vmatpush.bf16.msra.mxu2 %v658_v11  ;;  %v670_v20 = vor.u32 %v715_v17, %v667_v18  ;;  %v707_v22 = vld [vmem:[#allocation8 + $0x74] sm:$0xf]  ;;  %vm373_vm3 = vcmask 523264  }
  0x1d   :  { %133 = vmatpush.bf16.msra.mxu0 %v125_v3  ;;  %173 = vmatpush.bf16.msra.mxu1 %v691_v7  ;;  %v631_v23 = vld [vmem:[#allocation8 + $0x8c] sm:$0xf0]  ;;  %v630_v24 = vor.u32 %v710_v21, %v629_v19  ;;  %v637_v26 = vld [vmem:[#allocation8 + $0x78] sm:$0xf]  ;;  %v711_v27 = vld [vmem:[#allocation8 + $0x90] sm:$0xf0] }
  0x1e   :  { %394 = vmatpush.bf16.msra.mxu3 %v662_v15  ;;  %v634_v25 = vor.u32 %v707_v22, %v631_v23  ;;  %v708_v28 = vld [vmem:[#allocation8 + $0x7c] sm:$0xf]  ;;  %v638_v29 = vor.u32 %v711_v27, %v637_v26  ;;  %v639_v30 = vld [vmem:[#allocation8 + $0x94] sm:$0xf0]  ;;  %v731_v32 = vld [vmem:[%s975_s2] ss:$0 sm:$0xff] }
  0x1f   :  { %v642_v31 = vor.u32 %v708_v28, %v639_v30  ;;  %v601_v38 = vld [vmem:[#allocation8 + $0x38] sm:$0xf]  ;;  %v703_v39 = vld [vmem:[#allocation8 + $0x50] sm:$0xf0]  ;;  %v700_v40 = vld [vmem:[#allocation8 + $0x3c] sm:$0xf] }
  0x20   :  { %382 = vmatpush.bf16.msra.mxu2 %v630_v24  ;;  %v602_v41 = vor.u32 %v703_v39, %v601_v38  ;;  %v603_v42 = vld [vmem:[#allocation8 + $0x54] sm:$0xf0]  ;;  %v609_v43 = vld [vmem:[#allocation8 + $0x40] sm:$0xf]  ;;  %v704_v44 = vld [vmem:[#allocation8 + $0x58] sm:$0xf0] }
  0x21   :  { %134 = vmatpush.bf16.msra.mxu0 %v690_v4  ;;  %420 = vmatpush.bf16.msrb.mxu1 %v670_v20  ;;  %v606_v45 = vor.u32 %v700_v40, %v603_v42  ;;  %v610_v46 = vor.u32 %v704_v44, %v609_v43  ;;  %v701_v47 = vld [vmem:[#allocation8 + $0x44] sm:$0xf]  ;;  %v611_v48 = vld [vmem:[#allocation8 + $0x5c] sm:$0xf0]  ;;  %v696_v51 = vld [vmem:[#allocation8 + $0x18] sm:$0xf0] }
  0x22   :  { %395 = vmatpush.bf16.msra.mxu3 %v634_v25  ;;  %v614_v49 = vor.u32 %v701_v47, %v611_v48  ;;  %v573_v50 = vld [vmem:[#allocation8] sm:$0xf]  ;;  %v693_v52 = vld [vmem:[#allocation8 + $0x4] sm:$0xf]  ;;  %v581_v55 = vld [vmem:[#allocation8 + $0x8] sm:$0xf] }
  0x23   :  { %v574_v53 = vor.u32 %v696_v51, %v573_v50  ;;  %v575_v54 = vld [vmem:[#allocation8 + $0x1c] sm:$0xf0]  ;;  %v697_v56 = vld [vmem:[#allocation8 + $0x20] sm:$0xf0]  ;;  %v694_v59 = vld [vmem:[#allocation8 + $0xc] sm:$0xf] }
  0x24   :  { %561 = vmatmul.msk.bf16.vlgmr.msra.gmra.mxu0 %vm119_vm1, %v102_v5  ;;  %383 = vmatpush.bf16.msra.mxu2 %v602_v41  ;;  %v578_v57 = vor.u32 %v693_v52, %v575_v54  ;;  %v582_v58 = vor.u32 %v697_v56, %v581_v55  ;;  %v583_v60 = vld [vmem:[#allocation8 + $0x24] sm:$0xf0]  ;;  %v673_v62 = vld [vmem:[#allocation8 + $0xb8] sm:$0xf]  ;;  %v719_v63 = vld [vmem:[#allocation8 + $0xd0] sm:$0xf0] }
  0x25   :  { %407 = vmatpush.bf16.msrb.mxu0 %v666_v16  ;;  %421 = vmatpush.bf16.msrb.mxu1 %v642_v31  ;;  %v586_v61 = vor.u32 %v694_v59, %v583_v60  ;;  %v716_v0 = vld [vmem:[#allocation8 + $0xbc] sm:$0xf]  ;;  %v674_v1 = vor.u32 %v719_v63, %v673_v62  ;;  %v675_v2 = vld [vmem:[#allocation8 + $0xd4] sm:$0xf0]  ;;  %v681_v3 = vld [vmem:[#allocation8 + $0xc0] sm:$0xf] }
  0x26   :  { %396 = vmatpush.bf16.msra.mxu3 %v606_v45  ;;  %v720_v4 = vld [vmem:[#allocation8 + $0xd8] sm:$0xf0]  ;;  %v678_v5 = vor.u32 %v716_v0, %v675_v2  ;;  %v645_v7 = vld [vmem:[#allocation8 + $0x80] sm:$0xf]  ;;  %v709_v9 = vld [vmem:[#allocation8 + $0x84] sm:$0xf] }
  0x27   :  { %v682_v6 = vor.u32 %v720_v4, %v681_v3  ;;  %v712_v8 = vld [vmem:[#allocation8 + $0x98] sm:$0xf0]  ;;  %v647_v11 = vld [vmem:[#allocation8 + $0x9c] sm:$0xf0]  ;;  %v653_v12 = vld [vmem:[#allocation8 + $0x88] sm:$0xf] }
  0x28   :  { %384 = vmatpush.bf16.msra.mxu2 %v574_v53  ;;  %v646_v10 = vor.u32 %v712_v8, %v645_v7  ;;  %v713_v13 = vld [vmem:[#allocation8 + $0xa0] sm:$0xf0]  ;;  %v650_v14 = vor.u32 %v709_v9, %v647_v11  ;;  %v617_v16 = vld [vmem:[#allocation8 + $0x48] sm:$0xf]  ;;  %v702_v18 = vld [vmem:[#allocation8 + $0x4c] sm:$0xf] }
  0x29   :  { %408 = vmatpush.bf16.msrb.mxu0 %v638_v29  ;;  %422 = vmatpush.bf16.msrb.mxu1 %v614_v49  ;;  %v654_v15 = vor.u32 %v713_v13, %v653_v12  ;;  %v705_v17 = vld [vmem:[#allocation8 + $0x60] sm:$0xf0]  ;;  %v619_v19 = vld [vmem:[#allocation8 + $0x64] sm:$0xf0]  ;;  %v625_v20 = vld [vmem:[#allocation8 + $0x50] sm:$0xf] }
  0x2a   :  { %397 = vmatpush.bf16.msra.mxu3 %v578_v57  ;;  %v706_v21 = vld [vmem:[#allocation8 + $0x68] sm:$0xf0]  ;;  %v618_v22 = vor.u32 %v705_v17, %v617_v16  ;;  %v622_v23 = vor.u32 %v702_v18, %v619_v19  ;;  %v589_v25 = vld [vmem:[#allocation8 + $0x10] sm:$0xf]  ;;  %v695_v27 = vld [vmem:[#allocation8 + $0x14] sm:$0xf] }
  0x2b   :  { %v626_v24 = vor.u32 %v706_v21, %v625_v20  ;;  %v698_v26 = vld [vmem:[#allocation8 + $0x28] sm:$0xf0]  ;;  %v591_v28 = vld [vmem:[#allocation8 + $0x2c] sm:$0xf0]  ;;  %v597_v29 = vld [vmem:[#allocation8 + $0x18] sm:$0xf] }
  0x2c   :  { %433 = vmatpush.bf16.msrb.mxu2 %v674_v1  ;;  %v699_v30 = vld [vmem:[#allocation8 + $0x30] sm:$0xf0]  ;;  %v590_v31 = vor.u32 %v698_v26, %v589_v25  ;;  %v213_v40 = vld [vmem:[#allocation10] sm:$0x7f]  ;;  %vm536_vm4 = vcmask 125952   ;;  %s545_s8 = sshll.u32 %s980_s7, 4  ;;  %s546_s8 = int_to_ptr.hbm [resolvable:$true] %s545_s8 }
  0x2d   :  { %409 = vmatpush.bf16.msrb.mxu0 %v610_v46  ;;  %423 = vmatpush.bf16.msrb.mxu1 %v586_v61  ;;  %v217_v41 = vperm.slane %v213_v40, 2  ;;  %v218_v42 = vperm.slane %v213_v40, 3  ;;  %v215_v47 = vperm.slane %v213_v40, 0  ;;  %v216_v48 = vperm.slane %v213_v40, 1 }
  0x2e   :  { %446 = vmatpush.bf16.msrb.mxu3 %v678_v5  ;;  %v221_v3 = vperm.slane %v213_v40, 6  ;;  %v219_v9 = vperm.slane %v213_v40, 4 }
  0x30   :  { %434 = vmatpush.bf16.msrb.mxu2 %v646_v10  ;;  %v220_v10 = vperm.slane %v213_v40, 5 }
  0x31   :  { %410 = vmatpush.bf16.msrb.mxu0 %v582_v58 }
  0x32   :  { %447 = vmatpush.bf16.msrb.mxu3 %v650_v14 }
  0x34   :  { %435 = vmatpush.bf16.msrb.mxu2 %v618_v22 }
  0x35   :  { %459 = vmatpush.bf16.msra.mxu0 %v682_v6 }
  0x36   :  { %448 = vmatpush.bf16.msrb.mxu3 %v622_v23 }
  0x38   :  { %436 = vmatpush.bf16.msrb.mxu2 %v590_v31 }
  0x39   :  { %460 = vmatpush.bf16.msra.mxu0 %v654_v15 }
  0x3d   :  { %461 = vmatpush.bf16.msra.mxu0 %v626_v24 }
  0xa1   :  { %v136_v33 = vpop.f32.mrf.mxu0 }
  0xa2   :  { %v137_v34 = vadd.f32 %v731_v32, %v136_v33  ;;  %v594_v32 = vor.u32 %v695_v27, %v591_v28  ;;  %v598_v33 = vor.u32 %v699_v30, %v597_v29 }
  0xa4   :  { %v140_v35 = vmax.f32 %v137_v34, 0.0  ;;  %449 = vmatpush.bf16.msrb.mxu3 %v594_v32  ;;  %462 = vmatpush.bf16.msra.mxu0 %v598_v33  ;;  %v732_v34 = vld [vmem:[%s977_s4] ss:$0 sm:$0xff]  ;;  %s908_s4 = smov [#allocation11]  }
  0xa5   :  { %s543_s28 = sshll.u32 %s908_s4, 4  ;;  %s544_s28 = int_to_ptr.vmem [resolvable:$true] %s543_s28 }
  0xa6   :  { %v141_v36 = vpack.c.bf16 %v140_v35, %v140_v35 }
  0xa8   :  { %570 = vmatmul.msk.bf16.vlgmr.msra.gmra.mxu1 %vm162_vm2, %v141_v36 }
  0xa9   :  { %v138_v37 = vpop.f32.mrf.mxu0 }
 0x125   :  { %v175_v35 = vpop.f32.mrf.mxu1 }
 0x126   :  { %v176_v36 = vadd.f32 %v732_v34, %v175_v35 }
 0x128   :  { %v179_v37 = vmax.f32 %v176_v36, 0.0 }
 0x12a   :  { %v180_v38 = vpack.c.bf16 %v179_v37, %v179_v37 }
 0x12c   :  { %683 = vmatmul.msk.bf16.vlgmr.msra.gmra.mxu2 %vm373_vm3, %v180_v38  ;;  %684 = vmatmul.msk.bf16.vlgmr.msra.gmra.mxu3 %vm373_vm3, %v180_v38 }
 0x12d   :  { %685 = vmatmul.msk.bf16.vlgmr.msrb.gmra.mxu0 %vm373_vm3, %v180_v38  ;;  %686 = vmatmul.msk.bf16.vlgmr.msrb.gmra.mxu1 %vm373_vm3, %v180_v38  ;;  %v177_v39 = vpop.f32.mrf.mxu1 }
 0x13c   :  { %687 = vmatmul.msk.bf16.vlgmr.msrb.gmra.mxu2 %vm373_vm3, %v180_v38  ;;  %688 = vmatmul.msk.bf16.vlgmr.msrb.gmra.mxu3 %vm373_vm3, %v180_v38 }
 0x13d   :  { %689 = vmatmul.msk.bf16.vlgmr.msra.gmra.mxu0 %vm373_vm3, %v180_v38 }
 0x1aa   :  { %v412_v43 = vpop.f32.mrf.mxu0  ;;  %v425_v44 = vpop.f32.mrf.mxu1 }
 0x1ab   :  { %v413_v45 = vadd.f32 %v412_v43, %v217_v41  ;;  %v426_v46 = vadd.f32 %v425_v44, %v218_v42 }
 0x1ad   :  { %v470_v49 = vmul.f32 0.5, %v413_v45  ;;  %v471_v50 = vmul.f32 0.5, %v426_v46 }
 0x1af   :  { %v476_v51 = vpack.c.bf16 %v471_v50, %v470_v49  ;;  %v386_v52 = vpop.f32.mrf.mxu2  ;;  %v399_v53 = vpop.f32.mrf.mxu3 }
 0x1b0   :  { %v387_v54 = vadd.f32 %v386_v52, %v215_v47  ;;  %v400_v55 = vadd.f32 %v399_v53, %v216_v48 }
 0x1b1   :  { %v481_v56 = vunpack.c.l.bf16 %v476_v51  ;;  %v482_v57 = vunpack.c.h.bf16 %v476_v51 }
 0x1b2   :  { %v468_v58 = vmul.f32 0.5, %v387_v54  ;;  %v469_v59 = vmul.f32 0.5, %v400_v55  ;;  %v414_v60 = vpop.f32.mrf.mxu0  ;;  %v427_v61 = vpop.f32.mrf.mxu1 }
 0x1b3   :  { %733 = vtanh.f32 %v481_v56 }
 0x1b4   :  { %735 = vtanh.f32 %v482_v57  ;;  %v475_v62 = vpack.c.bf16 %v469_v59, %v468_v58 }
 0x1b6   :  { %v479_v63 = vunpack.c.l.bf16 %v475_v62  ;;  %v480_v0 = vunpack.c.h.bf16 %v475_v62 }
 0x1b7   :  { %v388_v1 = vpop.f32.mrf.mxu2  ;;  %v401_v2 = vpop.f32.mrf.mxu3 }
 0x1b8   :  { %737 = vtanh.f32 %v479_v63 }
 0x1b9   :  { %v734_v4 = vpop.eup %733  ;;  %739 = vtanh.f32 %v480_v0 }
 0x1ba   :  { %v736_v5 = vpop.eup %735  ;;  %v464_v6 = vpop.f32.mrf.mxu0 }
 0x1bb   :  { %v494_v7 = vpack.c.bf16 %v736_v5, %v734_v4  ;;  %v465_v8 = vadd.f32 %v464_v6, %v221_v3 }
 0x1bd   :  { %v499_v11 = vunpack.c.l.bf16 %v494_v7  ;;  %v500_v12 = vunpack.c.h.bf16 %v494_v7  ;;  %v474_v13 = vmul.f32 0.5, %v465_v8 }
 0x1be   :  { %v738_v14 = vpop.eup %737 }
 0x1bf   :  { %v740_v15 = vpop.eup %739  ;;  %v506_v16 = vadd.f32 1.0, %v499_v11  ;;  %v507_v17 = vadd.f32 1.0, %v500_v12  ;;  %v478_v18 = vpack.c.bf16 %v474_v13, %v474_v13  ;;  %v438_v19 = vpop.f32.mrf.mxu2 }
 0x1c0   :  { %v451_v20 = vpop.f32.mrf.mxu3  ;;  %v493_v21 = vpack.c.bf16 %v740_v15, %v738_v14  ;;  %v439_v22 = vadd.f32 %v438_v19, %v219_v9 }
 0x1c1   :  { %v452_v23 = vadd.f32 %v451_v20, %v220_v10  ;;  %v512_v24 = vpack.c.bf16 %v507_v17, %v506_v16  ;;  %v485_v25 = vunpack.c.l.bf16 %v478_v18 }
 0x1c2   :  { %v497_v26 = vunpack.c.l.bf16 %v493_v21  ;;  %v498_v27 = vunpack.c.h.bf16 %v493_v21  ;;  %v472_v28 = vmul.f32 0.5, %v439_v22  ;;  %v466_v30 = vpop.f32.mrf.mxu0 }
 0x1c3   :  { %v473_v29 = vmul.f32 0.5, %v452_v23  ;;  %741 = vtanh.f32 %v485_v25  ;;  %v517_v31 = vunpack.c.l.bf16 %v512_v24  ;;  %v518_v32 = vunpack.c.h.bf16 %v512_v24 }
 0x1c4   :  { %v504_v33 = vadd.f32 1.0, %v497_v26  ;;  %v505_v34 = vadd.f32 1.0, %v498_v27 }
 0x1c5   :  { %v477_v35 = vpack.c.bf16 %v473_v29, %v472_v28  ;;  %v524_v36 = vmul.f32 0.5, %v517_v31  ;;  %v525_v37 = vmul.f32 0.5, %v518_v32 }
 0x1c6   :  { %v511_v38 = vpack.c.bf16 %v505_v34, %v504_v33 }
 0x1c7   :  { %v483_v39 = vunpack.c.l.bf16 %v477_v35  ;;  %v484_v40 = vunpack.c.h.bf16 %v477_v35  ;;  %v440_v41 = vpop.f32.mrf.mxu2  ;;  %v530_v43 = vpack.c.bf16 %v525_v37, %v524_v36 }
 0x1c8   :  { %v453_v42 = vpop.f32.mrf.mxu3  ;;  %v515_v44 = vunpack.c.l.bf16 %v511_v38  ;;  %v516_v45 = vunpack.c.h.bf16 %v511_v38 }
 0x1c9   :  { %743 = vtanh.f32 %v483_v39  ;;  %v742_v46 = vpop.eup %741  ;;  %534 = vst [vmem:[#allocation11 + $0x8] sm:$0xff] %v530_v43 }
 0x1ca   :  { %745 = vtanh.f32 %v484_v40  ;;  %v496_v47 = vpack.c.bf16 %v742_v46, %v742_v46  ;;  %v522_v48 = vmul.f32 0.5, %v515_v44  ;;  %v523_v49 = vmul.f32 0.5, %v516_v45 }
 0x1cc   :  { %v503_v50 = vunpack.c.l.bf16 %v496_v47  ;;  %v529_v51 = vpack.c.bf16 %v523_v49, %v522_v48 }
 0x1ce   :  { %v510_v53 = vadd.f32 1.0, %v503_v50  ;;  %533 = vst [vmem:[#allocation11] sm:$0xff] %v529_v51 }
 0x1cf   :  { %v744_v52 = vpop.eup %743 }
 0x1d0   :  { %v746_v54 = vpop.eup %745  ;;  %v514_v55 = vpack.c.bf16 %v510_v53, %v510_v53 }
 0x1d1   :  { %v495_v56 = vpack.c.bf16 %v746_v54, %v744_v52 }
 0x1d2   :  { %v521_v57 = vunpack.c.l.bf16 %v514_v55 }
 0x1d3   :  { %v501_v58 = vunpack.c.l.bf16 %v495_v56  ;;  %v502_v59 = vunpack.c.h.bf16 %v495_v56 }
 0x1d4   :  { %v528_v60 = vmul.f32 0.5, %v521_v57 }
 0x1d5   :  { %v508_v61 = vadd.f32 1.0, %v501_v58  ;;  %v509_v62 = vadd.f32 1.0, %v502_v59 }
 0x1d6   :  { %v532_v63 = vpack.c.bf16 %v528_v60, %v528_v60 }
 0x1d7   :  { %v513_v0 = vpack.c.bf16 %v509_v62, %v508_v61 }
 0x1d8   :  { %537 = vst.msk [vmem:[#allocation11 + $0x18] sm:$0xf] %vm536_vm4, %v532_v63 }
 0x1d9   :  { %v519_v1 = vunpack.c.l.bf16 %v513_v0  ;;  %v520_v2 = vunpack.c.h.bf16 %v513_v0 }
 0x1db   :  { %v526_v3 = vmul.f32 0.5, %v519_v1  ;;  %v527_v4 = vmul.f32 0.5, %v520_v2 }
 0x1dd   :  { %v531_v5 = vpack.c.bf16 %v527_v4, %v526_v3 }
 0x1df   :  { %535 = vst [vmem:[#allocation11 + $0x10] sm:$0xff] %v531_v5 }
 0x1e0   :  { %548 = dma.vmem_to_hbm [thread:$0]  %s544_s28, 448, %s546_s8, [#allocation4]  }
 0x1e1   :  { %897 = dma.done.wait [#allocation4], 448  }
 0x1e2   :  { %898 = vsyncadd [#allocation4], 4294966848 }
 0x1e3   :  { %553 = vsyncpa [#allocation3], 1 }
 0x1e4   :  { %554 = vsyncpa [#allocation6], 1 }
 0x1e5   :  { %555 = vsyncpa [#allocation9], 1 }
 0x1e6   :  { %556 = vsyncpa [#allocation4], 1 }

</bundles_post_ra>
